<compile_context>
chip_gen: v7x
topology: tpu7x:2x2x1
jax: 0.10.0
libtpu: 0.0.40
codegen_flags: <defaults>
</compile_context>

<pallas_src>
import jax
import jax.numpy as jnp
from jax import lax
from jax.experimental import pallas as pl
from jax.experimental.pallas import tpu as pltpu

INPUT_SIZE = 4
HIDDEN_SIZE = 64
OUTPUT_SIZE = 2
LN_EPS = 1e-5  # torch.nn.LayerNorm default

# Column indices inside the packed [HIDDEN_SIZE, NUM_VEC_COLS] params array.
COL_B1, COL_G1, COL_BE1, COL_B2, COL_G2, COL_BE2, COL_B3 = range(7)
NUM_VEC_COLS = 8  # padded to 8 lanes


def _round_up(x, m):
    return ((x + m - 1) // m) * m


def _ln_relu_t(h, gamma, beta):
    """Fused LayerNorm + ReLU in feature-major layout.

    h: [HIDDEN, tb] f32 (features on sublanes, batch on lanes);
    gamma/beta: [HIDDEN, 1] f32.  One pass for both statistics; gamma/beta
    broadcast along lanes.
    """
    mean = jnp.mean(h, axis=0, keepdims=True)          # [1, tb]
    msq = jnp.mean(h * h, axis=0, keepdims=True)       # [1, tb]
    var = jnp.maximum(msq - mean * mean, 0.0)          # cancellation guard
    inv = lax.rsqrt(var + LN_EPS)                      # EUP
    return jnp.maximum((h - mean) * inv * gamma + beta, 0.0)


def policy_kernel(x_ref, w1_ref, w2_ref, w3_ref, vec_ref, o_ref):
    # x_ref: [INPUT_SIZE, tb] f32 (batch on lanes)
    # w1: [HIDDEN, INPUT] bf16, w2: [HIDDEN, HIDDEN] bf16, w3: [OUT, HIDDEN] bf16
    # vec_ref: [HIDDEN, 8] f32 packed per-layer vectors
    vecs = vec_ref[...]
    b1 = vecs[:, COL_B1:COL_B1 + 1]
    g1 = vecs[:, COL_G1:COL_G1 + 1]
    be1 = vecs[:, COL_BE1:COL_BE1 + 1]
    b2 = vecs[:, COL_B2:COL_B2 + 1]
    g2 = vecs[:, COL_G2:COL_G2 + 1]
    be2 = vecs[:, COL_BE2:COL_BE2 + 1]
    b3 = vecs[:OUTPUT_SIZE, COL_B3:COL_B3 + 1]          # [OUTPUT_SIZE, 1]

    x_bf = x_ref[...].astype(jnp.bfloat16)

    # Linear(input -> hidden) + LayerNorm + ReLU (feature-major: W @ x)
    h = jnp.dot(w1_ref[...], x_bf, preferred_element_type=jnp.float32) + b1
    h = _ln_relu_t(h, g1, be1)

    # Linear(hidden -> hidden) + LayerNorm + ReLU
    h = jnp.dot(w2_ref[...], h.astype(jnp.bfloat16),
                preferred_element_type=jnp.float32) + b2
    h = _ln_relu_t(h, g2, be2)

    # Linear(hidden -> output), tanh, * 0.1   -> [OUTPUT_SIZE, tb], lane-dense
    out = jnp.dot(w3_ref[...], h.astype(jnp.bfloat16),
                  preferred_element_type=jnp.float32) + b3
    o_ref[...] = (jnp.tanh(out) * 0.1).astype(o_ref.dtype)


def policy_forward(x, params, tile_batch=2048):
    """x: [batch, INPUT_SIZE] f32; params: (w1, w2, w3, vecs)."""
    w1, w2, w3, vecs = params
    batch = x.shape[0]

    if batch <= 256:
        # Single grid step: tile == whole (sublane-padded) batch, so block
        # last dims equal the full array dims and the (8,128) rule is met.
        tb = _round_up(max(batch, 8), 8)
        padded = tb
    else:
        # Multi-step path: tb multiple of 128 (lane-dense blocks) and capped so
        # the grid has >= 2 "parallel" steps (feeds both v7x TensorCores; the
        # extra ~0.35us step is noise on single-TC v5e/v6e).
        padded128 = _round_up(batch, 128)
        tb = min(_round_up(tile_batch, 128),
                 max(128, _round_up(pl.cdiv(padded128, 2), 128)))
        padded = _round_up(batch, tb)

    if padded != batch:
        x = jnp.pad(x, ((0, padded - batch), (0, 0)))
    x_t = x.T  # [INPUT_SIZE, padded]: batch on the lane axis

    out_t = pl.pallas_call(
        policy_kernel,
        out_shape=jax.ShapeDtypeStruct((OUTPUT_SIZE, padded), jnp.float32),
        grid_spec=pltpu.PrefetchScalarGridSpec(
            num_scalar_prefetch=0,
            grid=(padded // tb,),
            in_specs=[
                # activations tiled along batch (lane axis)
                pl.BlockSpec((INPUT_SIZE, tb), lambda i: (0, i)),
                # weights / packed vectors stay VMEM-resident across steps
                pl.BlockSpec((HIDDEN_SIZE, INPUT_SIZE), lambda i: (0, 0)),
                pl.BlockSpec((HIDDEN_SIZE, HIDDEN_SIZE), lambda i: (0, 0)),
                pl.BlockSpec((OUTPUT_SIZE, HIDDEN_SIZE), lambda i: (0, 0)),
                pl.BlockSpec((HIDDEN_SIZE, NUM_VEC_COLS), lambda i: (0, 0)),
            ],
            out_specs=pl.BlockSpec((OUTPUT_SIZE, tb), lambda i: (0, i)),
        ),
        compiler_params=pltpu.CompilerParams(
            dimension_semantics=("parallel",)),  # megacore-shard batch on v7x
    )(x_t, w1, w2, w3, vecs)

    return out_t[:, :batch].T  # back to [batch, OUTPUT_SIZE]


def xavier_uniform(key, fan_out, fan_in, gain=0.1):
    # torch.nn.init.xavier_uniform_ on a [fan_out, fan_in] weight (PyTorch
    # layout), stored in bf16 for native-rate MXU matmuls.
    bound = gain * (6.0 / (fan_in + fan_out)) ** 0.5
    w = jax.random.uniform(key, (fan_out, fan_in), jnp.float32,
                           minval=-bound, maxval=bound)
    return w.astype(jnp.bfloat16)


def init_params(key):
    k1, k2, k3 = jax.random.split(key, 3)
    w1 = xavier_uniform(k1, HIDDEN_SIZE, INPUT_SIZE)
    w2 = xavier_uniform(k2, HIDDEN_SIZE, HIDDEN_SIZE)
    w3 = xavier_uniform(k3, OUTPUT_SIZE, HIDDEN_SIZE)
    # Packed per-layer vectors (f32): biases/betas zero, gammas one.
    vecs = jnp.zeros((HIDDEN_SIZE, NUM_VEC_COLS), jnp.float32)
    vecs = vecs.at[:, COL_G1].set(1.0).at[:, COL_G2].set(1.0)
    return (w1, w2, w3, vecs)


def policy_ref(x, params):
    # Pure-JAX reference with the same bf16 cast points, for verification.
    w1, w2, w3, vecs = params
    b1, g1, be1 = vecs[:, COL_B1], vecs[:, COL_G1], vecs[:, COL_BE1]
    b2, g2, be2 = vecs[:, COL_B2], vecs[:, COL_G2], vecs[:, COL_BE2]
    b3 = vecs[:OUTPUT_SIZE, COL_B3]

    def ln(h, g, b):
        m = h.mean(-1, keepdims=True)
        v = h.var(-1, keepdims=True)
        return (h - m) / jnp.sqrt(v + LN_EPS) * g + b

    h = jnp.dot(x.astype(jnp.bfloat16), w1.T,
                preferred_element_type=jnp.float32) + b1
    h = jnp.maximum(ln(h, g1, be1), 0.0)
    h = jnp.dot(h.astype(jnp.bfloat16), w2.T,
                preferred_element_type=jnp.float32) + b2
    h = jnp.maximum(ln(h, g2, be2), 0.0)
    out = jnp.dot(h.astype(jnp.bfloat16), w3.T,
                  preferred_element_type=jnp.float32) + b3
    return jnp.tanh(out) * 0.1


if __name__ == "__main__":
    key = jax.random.PRNGKey(0)
    kp, kx = jax.random.split(key)
    params = init_params(kp)

    batch = 8
    x = jax.random.normal(kx, (batch, INPUT_SIZE), jnp.float32)

    out = policy_forward(x, params)
    jax.block_until_ready(out)

    ref = policy_ref(x, params)
    assert out.shape == (batch, OUTPUT_SIZE)
    assert jnp.allclose(out, ref, atol=1e-5, rtol=1e-4), (
        f"max abs diff {jnp.max(jnp.abs(out - ref))}")

    print("KERNEL_OK")
</pallas_src>

<mosaic_0001>
module attributes {stable_mosaic.version = 11 : i64} {
  func.func @policy_kernel(%arg0: i32, %arg1: memref<4x8xf32, #tpu.memory_space<vmem>>, %arg2: memref<64x4xbf16, #tpu.memory_space<vmem>>, %arg3: memref<64x64xbf16, #tpu.memory_space<vmem>>, %arg4: memref<2x64xbf16, #tpu.memory_space<vmem>>, %arg5: memref<64x8xf32, #tpu.memory_space<vmem>>, %arg6: memref<2x8xf32, #tpu.memory_space<vmem>>) attributes {dimension_semantics = [#tpu.dimension_semantics<parallel>], iteration_bounds = array<i64: 1>, scalar_prefetch = 0 : i64, scratch_operands = 0 : i64, tpu.core_type = #tpu.core_type<tc>, window_params = [{transform_indices = @transform_0, window_bounds = array<i64: 4, 8>}, {pipeline_mode = #tpu.pipeline_mode<synchronous>, transform_indices = @transform_1, window_bounds = array<i64: 64, 4>}, {pipeline_mode = #tpu.pipeline_mode<synchronous>, transform_indices = @transform_2, window_bounds = array<i64: 64, 64>}, {pipeline_mode = #tpu.pipeline_mode<synchronous>, transform_indices = @transform_3, window_bounds = array<i64: 2, 64>}, {pipeline_mode = #tpu.pipeline_mode<synchronous>, transform_indices = @transform_4, window_bounds = array<i64: 64, 8>}, {transform_indices = @transform_5, window_bounds = array<i64: 2, 8>}]} {
    %c0 = arith.constant 0 : index
    %c0_0 = arith.constant 0 : index
    %0 = vector.load %arg5[%c0, %c0_0] : memref<64x8xf32, #tpu.memory_space<vmem>>, vector<64x8xf32>
    %1 = vector.extract_strided_slice %0 {offsets = [0, 0], sizes = [64, 1], strides = [1, 1]} : vector<64x8xf32> to vector<64x1xf32>
    %2 = vector.extract_strided_slice %0 {offsets = [0, 1], sizes = [64, 1], strides = [1, 1]} : vector<64x8xf32> to vector<64x1xf32>
    %3 = vector.extract_strided_slice %0 {offsets = [0, 2], sizes = [64, 1], strides = [1, 1]} : vector<64x8xf32> to vector<64x1xf32>
    %4 = vector.extract_strided_slice %0 {offsets = [0, 3], sizes = [64, 1], strides = [1, 1]} : vector<64x8xf32> to vector<64x1xf32>
    %5 = vector.extract_strided_slice %0 {offsets = [0, 4], sizes = [64, 1], strides = [1, 1]} : vector<64x8xf32> to vector<64x1xf32>
    %6 = vector.extract_strided_slice %0 {offsets = [0, 5], sizes = [64, 1], strides = [1, 1]} : vector<64x8xf32> to vector<64x1xf32>
    %7 = vector.extract_strided_slice %0 {offsets = [0, 6], sizes = [2, 1], strides = [1, 1]} : vector<64x8xf32> to vector<2x1xf32>
    %c0_1 = arith.constant 0 : index
    %c0_2 = arith.constant 0 : index
    %8 = vector.load %arg1[%c0_1, %c0_2] : memref<4x8xf32, #tpu.memory_space<vmem>>, vector<4x8xf32>
    %9 = arith.truncf %8 : vector<4x8xf32> to vector<4x8xbf16>
    %c0_3 = arith.constant 0 : index
    %c0_4 = arith.constant 0 : index
    %10 = vector.load %arg2[%c0_3, %c0_4] : memref<64x4xbf16, #tpu.memory_space<vmem>>, vector<64x4xbf16>
    %cst = arith.constant dense<0.000000e+00> : vector<64x8xf32>
    %11 = tpu.matmul %10, %9, %cst {dimension_numbers = #tpu.dot_dimension_numbers<[1], [0], [0], [1], [0, 0, 1, 1], [], []>} : vector<64x4xbf16>, vector<4x8xbf16>, vector<64x8xf32> -> vector<64x8xf32>
    %12 = vector.broadcast %1 : vector<64x1xf32> to vector<64x8xf32>
    %13 = arith.addf %11, %12 : vector<64x8xf32>
    %cst_5 = arith.constant dense<0.000000e+00> : vector<8xf32>
    %14 = vector.multi_reduction <add>, %13, %cst_5 [0] : vector<64x8xf32> to vector<8xf32>
    %15 = vector.shape_cast %14 : vector<8xf32> to vector<1x8xf32>
    %cst_6 = arith.constant 6.400000e+01 : f32
    %16 = vector.broadcast %cst_6 : f32 to vector<1x8xf32>
    %17 = arith.divf %15, %16 : vector<1x8xf32>
    %18 = arith.mulf %13, %13 : vector<64x8xf32>
    %cst_7 = arith.constant dense<0.000000e+00> : vector<8xf32>
    %19 = vector.multi_reduction <add>, %18, %cst_7 [0] : vector<64x8xf32> to vector<8xf32>
    %20 = vector.shape_cast %19 : vector<8xf32> to vector<1x8xf32>
    %cst_8 = arith.constant 6.400000e+01 : f32
    %21 = vector.broadcast %cst_8 : f32 to vector<1x8xf32>
    %22 = arith.divf %20, %21 : vector<1x8xf32>
    %23 = arith.mulf %17, %17 : vector<1x8xf32>
    %24 = arith.subf %22, %23 : vector<1x8xf32>
    %cst_9 = arith.constant 0.000000e+00 : f32
    %25 = vector.broadcast %cst_9 : f32 to vector<1x8xf32>
    %26 = arith.maximumf %24, %25 : vector<1x8xf32>
    %cst_10 = arith.constant 9.99999974E-6 : f32
    %27 = vector.broadcast %cst_10 : f32 to vector<1x8xf32>
    %28 = arith.addf %26, %27 : vector<1x8xf32>
    %29 = math.rsqrt %28 : vector<1x8xf32>
    %30 = vector.broadcast %17 : vector<1x8xf32> to vector<64x8xf32>
    %31 = arith.subf %13, %30 : vector<64x8xf32>
    %32 = vector.broadcast %29 : vector<1x8xf32> to vector<64x8xf32>
    %33 = arith.mulf %31, %32 : vector<64x8xf32>
    %34 = vector.broadcast %2 : vector<64x1xf32> to vector<64x8xf32>
    %35 = arith.mulf %33, %34 : vector<64x8xf32>
    %36 = vector.broadcast %3 : vector<64x1xf32> to vector<64x8xf32>
    %37 = arith.addf %35, %36 : vector<64x8xf32>
    %cst_11 = arith.constant 0.000000e+00 : f32
    %38 = vector.broadcast %cst_11 : f32 to vector<64x8xf32>
    %39 = arith.maximumf %37, %38 : vector<64x8xf32>
    %c0_12 = arith.constant 0 : index
    %c0_13 = arith.constant 0 : index
    %40 = vector.load %arg3[%c0_12, %c0_13] : memref<64x64xbf16, #tpu.memory_space<vmem>>, vector<64x64xbf16>
    %41 = arith.truncf %39 : vector<64x8xf32> to vector<64x8xbf16>
    %cst_14 = arith.constant dense<0.000000e+00> : vector<64x8xf32>
    %42 = tpu.matmul %40, %41, %cst_14 {dimension_numbers = #tpu.dot_dimension_numbers<[1], [0], [0], [1], [0, 0, 1, 1], [], []>} : vector<64x64xbf16>, vector<64x8xbf16>, vector<64x8xf32> -> vector<64x8xf32>
    %43 = vector.broadcast %4 : vector<64x1xf32> to vector<64x8xf32>
    %44 = arith.addf %42, %43 : vector<64x8xf32>
    %cst_15 = arith.constant dense<0.000000e+00> : vector<8xf32>
    %45 = vector.multi_reduction <add>, %44, %cst_15 [0] : vector<64x8xf32> to vector<8xf32>
    %46 = vector.shape_cast %45 : vector<8xf32> to vector<1x8xf32>
    %cst_16 = arith.constant 6.400000e+01 : f32
    %47 = vector.broadcast %cst_16 : f32 to vector<1x8xf32>
    %48 = arith.divf %46, %47 : vector<1x8xf32>
    %49 = arith.mulf %44, %44 : vector<64x8xf32>
    %cst_17 = arith.constant dense<0.000000e+00> : vector<8xf32>
    %50 = vector.multi_reduction <add>, %49, %cst_17 [0] : vector<64x8xf32> to vector<8xf32>
    %51 = vector.shape_cast %50 : vector<8xf32> to vector<1x8xf32>
    %cst_18 = arith.constant 6.400000e+01 : f32
    %52 = vector.broadcast %cst_18 : f32 to vector<1x8xf32>
    %53 = arith.divf %51, %52 : vector<1x8xf32>
    %54 = arith.mulf %48, %48 : vector<1x8xf32>
    %55 = arith.subf %53, %54 : vector<1x8xf32>
    %cst_19 = arith.constant 0.000000e+00 : f32
    %56 = vector.broadcast %cst_19 : f32 to vector<1x8xf32>
    %57 = arith.maximumf %55, %56 : vector<1x8xf32>
    %cst_20 = arith.constant 9.99999974E-6 : f32
    %58 = vector.broadcast %cst_20 : f32 to vector<1x8xf32>
    %59 = arith.addf %57, %58 : vector<1x8xf32>
    %60 = math.rsqrt %59 : vector<1x8xf32>
    %61 = vector.broadcast %48 : vector<1x8xf32> to vector<64x8xf32>
    %62 = arith.subf %44, %61 : vector<64x8xf32>
    %63 = vector.broadcast %60 : vector<1x8xf32> to vector<64x8xf32>
    %64 = arith.mulf %62, %63 : vector<64x8xf32>
    %65 = vector.broadcast %5 : vector<64x1xf32> to vector<64x8xf32>
    %66 = arith.mulf %64, %65 : vector<64x8xf32>
    %67 = vector.broadcast %6 : vector<64x1xf32> to vector<64x8xf32>
    %68 = arith.addf %66, %67 : vector<64x8xf32>
    %cst_21 = arith.constant 0.000000e+00 : f32
    %69 = vector.broadcast %cst_21 : f32 to vector<64x8xf32>
    %70 = arith.maximumf %68, %69 : vector<64x8xf32>
    %c0_22 = arith.constant 0 : index
    %c0_23 = arith.constant 0 : index
    %71 = vector.load %arg4[%c0_22, %c0_23] : memref<2x64xbf16, #tpu.memory_space<vmem>>, vector<2x64xbf16>
    %72 = arith.truncf %70 : vector<64x8xf32> to vector<64x8xbf16>
    %cst_24 = arith.constant dense<0.000000e+00> : vector<2x8xf32>
    %73 = tpu.matmul %71, %72, %cst_24 {dimension_numbers = #tpu.dot_dimension_numbers<[1], [0], [0], [1], [0, 0, 1, 1], [], []>} : vector<2x64xbf16>, vector<64x8xbf16>, vector<2x8xf32> -> vector<2x8xf32>
    %74 = vector.broadcast %7 : vector<2x1xf32> to vector<2x8xf32>
    %75 = arith.addf %73, %74 : vector<2x8xf32>
    %76 = math.tanh %75 : vector<2x8xf32>
    %cst_25 = arith.constant 1.000000e-01 : f32
    %77 = vector.broadcast %cst_25 : f32 to vector<2x8xf32>
    %78 = arith.mulf %76, %77 : vector<2x8xf32>
    %c0_26 = arith.constant 0 : index
    %c0_27 = arith.constant 0 : index
    %79 = vector.load %arg6[%c0_26, %c0_27] : memref<2x8xf32, #tpu.memory_space<vmem>>, vector<2x8xf32>
    tpu.vector_store %arg6[%c0_26, %c0_27], %78 {strides = array<i32>} : memref<2x8xf32, #tpu.memory_space<vmem>>, vector<2x8xf32>,
    return
  }
  func.func @transform_0(%arg0: i32) -> (i32, i32) {
    %c0_i32 = arith.constant 0 : i32
    %c0_i32_0 = arith.constant 0 : i32
    return %c0_i32, %arg0 : i32, i32
  }
  func.func @transform_1(%arg0: i32) -> (i32, i32) {
    %c0_i32 = arith.constant 0 : i32
    %c0_i32_0 = arith.constant 0 : i32
    %c0_i32_1 = arith.constant 0 : i32
    return %c0_i32, %c0_i32_0 : i32, i32
  }
  func.func @transform_2(%arg0: i32) -> (i32, i32) {
    %c0_i32 = arith.constant 0 : i32
    %c0_i32_0 = arith.constant 0 : i32
    %c0_i32_1 = arith.constant 0 : i32
    return %c0_i32, %c0_i32_0 : i32, i32
  }
  func.func @transform_3(%arg0: i32) -> (i32, i32) {
    %c0_i32 = arith.constant 0 : i32
    %c0_i32_0 = arith.constant 0 : i32
    %c0_i32_1 = arith.constant 0 : i32
    return %c0_i32, %c0_i32_0 : i32, i32
  }
  func.func @transform_4(%arg0: i32) -> (i32, i32) {
    %c0_i32 = arith.constant 0 : i32
    %c0_i32_0 = arith.constant 0 : i32
    %c0_i32_1 = arith.constant 0 : i32
    return %c0_i32, %c0_i32_0 : i32, i32
  }
  func.func @transform_5(%arg0: i32) -> (i32, i32) {
    %c0_i32 = arith.constant 0 : i32
    %c0_i32_0 = arith.constant 0 : i32
    return %c0_i32, %arg0 : i32, i32
  }
}

</mosaic_0001>

<bundles_post_ra>
// kernel: tpu_custom_call.1
= control target key start
LH: loop header
LB: loop body
LE: loop exit
PB: predicated region body
PF: predicated region fallthrough
CT: control target
= control target key end

     0   :  { %vm113_vm0 = vcmask 1041408   ;;  %vm100_vm1 = vcmask 31744   ;;  %v867_v8 = vmov 0   ;;  %s1209_s0 = inlined_call_operand.vmem [shape: f32[4,8], index: 0, kind: input, shape index: {}]   ;;  %s1210_s1 = inlined_call_operand.vmem [shape: bf16[64,4], index: 1, kind: input, shape index: {}]   ;;  %s1211_s2 = inlined_call_operand.vmem [shape: bf16[64,64], index: 2, kind: input, shape index: {}]   ;;  %s1212_s3 = inlined_call_operand.vmem [shape: bf16[2,64], index: 3, kind: input, shape index: {}]   ;;  %s1213_s4 = inlined_call_operand.vmem [shape: f32[64,8], index: 4, kind: input, shape index: {}]   ;;  %s1214_s5 = inlined_call_operand.hbm [shape: f32[2,8], index: 5, kind: output, shape index: {}]  }
   0x1   :  { %v30_v0 = vld [vmem:[%s1209_s0] sm:$0xf]  ;;  %v830_v4 = vld [vmem:[%s1210_s1 + $0x8] sm:$0xff]   ;;  %v831_v5 = vld [vmem:[%s1210_s1 + $0x10] sm:$0xff]   ;;  %802 = vset.pattern.permute.xlu0 %v867_v8  ;;  %803 = vset.pattern.permute.xlu1 %v867_v8 }
   0x2   :  { %v829_v1 = vld [vmem:[%s1210_s1] sm:$0xff]   ;;  %v31_v2 = vpack.c.bf16 %v30_v0, %v30_v0  ;;  %v928_v7 = vld [vmem:[%s1213_s4 + $0x10] sm:$0xff]  ;;  %v935_v9 = vld [vmem:[%s1213_s4 + $0x8] sm:$0xff] }
   0x3   :  { %755 = vmatprep.mubr.msk.bf16.mxu0 %vm100_vm1, %v829_v1  ;;  %v923_v6 = vld [vmem:[%s1213_s4] sm:$0xff]  ;;  %52 = vperm.xlu1 %803, %v928_v7   ;;  %v940_v10 = vld [vmem:[%s1213_s4 + $0x18] sm:$0xff] }
   0x4   :  { %791 = vmatprep.subr.msk.bf16.mxu0 %vm113_vm0, %v31_v2  ;;  %v115_v3 = vsel %vm113_vm0, %v31_v2, 0  ;;  %42 = vperm.xlu0 %802, %v923_v6  }
   0x5   :  { %754 = vmatpush3.bf16.msra.mxu0 %v115_v3 }
   0x8   :  { %756 = vmatmul.mubr.msk.bf16.vlgmr.msra.gmra.mrb[0].mxu0 %vm100_vm1, %v830_v4 }
   0x9   :  { %759 = vmatprep.mubr.msk.bf16.mxu0 %vm100_vm1, %v831_v5 }
   0xa   :  { %10 = vsyncpa [#allocation3], 0  ;;  %47 = vperm.xlu0 %802, %v935_v9   ;;  %57 = vperm.xlu1 %803, %v940_v10   ;;  %v832_v11 = vld [vmem:[%s1210_s1 + $0x18] sm:$0xff]   ;;  %v952_v12 = vld [vmem:[%s1213_s4 + $0x20] sm:$0xff]  ;;  %v868_v16 = vmov 1   ;;  %v869_v17 = vmov 2  }
   0xb   :  { %v957_v13 = vld [vmem:[%s1213_s4 + $0x28] sm:$0xff]  ;;  %v965_v14 = vld [vmem:[%s1213_s4 + $0x30] sm:$0xff]  ;;  %v970_v15 = vld [vmem:[%s1213_s4 + $0x38] sm:$0xff]  ;;  %vm409_vm2 = vcmask 523264   ;;  %v870_v19 = vmov 3   ;;  %v871_v20 = vmov 4  }
   0xc   :  { %v833_v18 = vld [vmem:[%s1211_s2] sm:$0xff]   ;;  %v872_v21 = vmov 5   ;;  %vm182_vm3 = vcmask 64512   ;;  %vm874_vm4 = vmmov 0   ;;  %s876_s25 = smov [#allocation2]   ;;  %vm702_vm5 = vcmask 58368  }
   0xd   :  { %771 = vmatprep.mubr.msk.bf16.mxu1 %vm409_vm2, %v833_v18  ;;  %s710_s0 = sshll.u32 %s876_s25, 4  ;;  %s711_s0 = int_to_ptr.vmem [resolvable:$true] %s710_s0 }
   0xe   :  { %62 = vperm.xlu0 %802, %v952_v12   ;;  %67 = vperm.xlu1 %803, %v957_v13   ;;  %s843_s26 = scalar_lea.vmem %s711_s0, 32  ;;  %p848_p1 = scmp.lt.s32.totalorder %s711_s0, %s711_s0 }
   0xf   :  { %p844_p0 = scmp.ne.s32.totalorder %s711_s0, %s843_s26  ;;  %p849_p2 = scmp.lt.s32.totalorder %s843_s26, %s843_s26 }
  0x10   :  { %760 = vmatmul.mubr.msk.bf16.gmra.mrb[4].mxu0 %vm100_vm1, %v832_v11 }
  0x11   :  { %p850_p3 = por %p849_p2, %p848_p1 }
  0x12   :  { %72 = vperm.xlu0 %802, %v965_v14   ;;  %77 = vperm.xlu1 %803, %v970_v15  }
  0x13   :  { %p851_p4 = pnand %p850_p3, %p844_p0 }
  0x16   :  { %805 = vset.pattern.permute.xlu1 %v868_v16  ;;  %804 = vset.pattern.permute.xlu0 %v868_v16 }
  0x17   :  { %262 = vperm.xlu1 %805, %v935_v9   ;;  %258 = vperm.xlu0 %804, %v923_v6  }
  0x1b   :  { %806 = vset.pattern.permute.xlu1 %v869_v17  ;;  %274 = vperm.xlu0 %804, %v952_v12  }
  0x1c   :  { %298 = vperm.xlu1 %806, %v923_v6  }
  0x1f   :  { %809 = vset.pattern.permute.xlu0 %v869_v17 }
  0x20   :  { %807 = vset.pattern.permute.xlu1 %v868_v16  ;;  %302 = vperm.xlu0 %809, %v935_v9  }
  0x21   :  { %266 = vperm.xlu1 %807, %v928_v7  }
  0x24   :  { %306 = vperm.xlu0 %809, %v928_v7  }
  0x25   :  { %270 = vperm.xlu1 %807, %v940_v10  }
  0x28   :  { %318 = vperm.xlu0 %809, %v957_v13  }
  0x29   :  { %808 = vset.pattern.permute.xlu1 %v869_v17 }
  0x2a   :  { %310 = vperm.xlu1 %808, %v940_v10  }
  0x2c   :  { %322 = vperm.xlu0 %809, %v965_v14  }
  0x2e   :  { %810 = vset.pattern.permute.xlu1 %v868_v16 }
  0x2f   :  { %278 = vperm.xlu1 %810, %v957_v13  }
  0x30   :  { %814 = vset.pattern.permute.xlu0 %v870_v19 }
  0x31   :  { %358 = vperm.xlu0 %814, %v923_v6  }
  0x33   :  { %811 = vset.pattern.permute.xlu1 %v869_v17 }
  0x34   :  { %314 = vperm.xlu1 %811, %v952_v12  }
  0x35   :  { %370 = vperm.xlu0 %814, %v940_v10  }
  0x38   :  { %812 = vset.pattern.permute.xlu1 %v868_v16 }
  0x39   :  { %282 = vperm.xlu1 %812, %v965_v14   ;;  %378 = vperm.xlu0 %814, %v957_v13  }
  0x3d   :  { %286 = vperm.xlu1 %812, %v970_v15   ;;  %386 = vperm.xlu0 %814, %v970_v15  }
  0x41   :  { %813 = vset.pattern.permute.xlu1 %v869_v17  ;;  %819 = vset.pattern.permute.xlu0 %v872_v21 }
  0x42   :  { %326 = vperm.xlu1 %813, %v970_v15   ;;  %609 = vperm.xlu0 %819, %v928_v7  }
  0x46   :  { %815 = vset.pattern.permute.xlu1 %v870_v19  ;;  %820 = vset.pattern.permute.xlu0 %v871_v20 }
  0x47   :  { %362 = vperm.xlu1 %815, %v935_v9   ;;  %565 = vperm.xlu0 %820, %v935_v9  }
  0x4b   :  { %366 = vperm.xlu1 %815, %v928_v7   ;;  %569 = vperm.xlu0 %820, %v928_v7  }
  0x4f   :  { %374 = vperm.xlu1 %815, %v952_v12   ;;  %581 = vperm.xlu0 %820, %v957_v13  }
  0x53   :  { %382 = vperm.xlu1 %815, %v965_v14   ;;  %585 = vperm.xlu0 %820, %v965_v14  }
  0x57   :  { %816 = vset.pattern.permute.xlu1 %v871_v20  ;;  %825 = vset.pattern.permute.xlu0 %v872_v21 }
  0x58   :  { %561 = vperm.xlu1 %816, %v923_v6   ;;  %625 = vperm.xlu0 %825, %v965_v14  }
  0x5c   :  { %817 = vset.pattern.permute.xlu1 %v872_v21 }
  0x5d   :  { %601 = vperm.xlu1 %817, %v923_v6  }
  0x61   :  { %605 = vperm.xlu1 %817, %v935_v9  }
  0x65   :  { %818 = vset.pattern.permute.xlu1 %v871_v20 }
  0x66   :  { %573 = vperm.xlu1 %818, %v940_v10  }
  0x6a   :  { %821 = vset.pattern.permute.xlu1 %v872_v21 }
  0x6b   :  { %613 = vperm.xlu1 %821, %v940_v10  }
  0x6f   :  { %822 = vset.pattern.permute.xlu1 %v871_v20 }
  0x70   :  { %577 = vperm.xlu1 %822, %v952_v12  }
  0x74   :  { %823 = vset.pattern.permute.xlu1 %v872_v21 }
  0x75   :  { %617 = vperm.xlu1 %823, %v952_v12  }
  0x79   :  { %621 = vperm.xlu1 %823, %v957_v13  }
  0x7d   :  { %824 = vset.pattern.permute.xlu1 %v871_v20 }
  0x7e   :  { %589 = vperm.xlu1 %824, %v970_v15  }
  0x82   :  { %v53_v22 = vpop.permute.xlu1 %52  ;;  %826 = vset.pattern.permute.xlu1 %v872_v21 }
  0x83   :  { %v43_v24 = vpop.permute.xlu0 %42  ;;  %629 = vperm.xlu1 %826, %v970_v15  }
  0x89   :  { %v58_v23 = vpop.permute.xlu1 %57  ;;  %v48_v26 = vpop.permute.xlu0 %47 }
  0x8d   :  { %v68_v25 = vpop.permute.xlu1 %67  ;;  %v63_v35 = vpop.permute.xlu0 %62 }
  0x91   :  { %v78_v27 = vpop.permute.xlu1 %77  ;;  %v73_v53 = vpop.permute.xlu0 %72 }
  0x96   :  { %v1024_v34 = vpop.permute.xlu1 %262 }
  0x9b   :  { %v1049_v52 = vpop.permute.xlu1 %298 }
  0xa0   :  { %v1076_v12 = vpop.permute.xlu1 %266 }
  0xdb   :  { %v757_v28 = vpop.f32.mrb[0].mxu0 }
  0xdc   :  { %v151_v29 = vpop.f32.mrb[1].mxu0  ;;  %v1019_v30 = vadd.f32 %v757_v28, %v53_v22 }
  0xdd   :  { %v1021_v31 = vadd.f32 %v151_v29, %v43_v24  ;;  %v758_v32 = vpop.f32.mrb[2].mxu0 }
  0xde   :  { %v154_v33 = vpop.f32.mrb[3].mxu0  ;;  %v1029_v37 = vadd.f32 %v758_v32, %v58_v23  ;;  %v208_v39 = vmul.f32 %v1019_v30, %v1019_v30  ;;  %v186_v44 = vsel %vm182_vm3, %v1019_v30, 0.0 }
  0xdf   :  { %v206_v36 = vmul.f32 %v1021_v31, %v1021_v31  ;;  %v1031_v38 = vadd.f32 %v154_v33, %v48_v26  ;;  %v183_v40 = vsel %vm182_vm3, %v1021_v31, 0.0 }
  0xe0   :  { %v209_v46 = vmul.f32 %v1029_v37, %v1029_v37  ;;  %v217_v54 = vsel %vm182_vm3, %v208_v39, 0.0  ;;  %v188_v55 = vsel %vm182_vm3, %v1029_v37, 0.0  ;;  %v259_v39 = vpop.permute.xlu0 %258 }
  0xe1   :  { %v184_v41 = vsel %vm182_vm3, %v1031_v38, 0.0  ;;  %v207_v42 = vmul.f32 %v1031_v38, %v1031_v38  ;;  %v214_v45 = vsel %vm182_vm3, %v206_v36, 0.0 }
  0xe2   :  { %v185_v43 = vadd.f32 %v184_v41, %v183_v40  ;;  %v219_v62 = vsel %vm182_vm3, %v209_v46, 0.0 }
  0xe3   :  { %v215_v47 = vsel %vm182_vm3, %v207_v42, 0.0  ;;  %v761_v48 = vpop.f32.mrb[4].mxu0 }
  0xe4   :  { %v187_v49 = vadd.f32 %v186_v44, %v185_v43  ;;  %v216_v50 = vadd.f32 %v215_v47, %v214_v45  ;;  %v167_v51 = vpop.f32.mrb[5].mxu0  ;;  %v1057_v59 = vadd.f32 %v761_v48, %v73_v53  ;;  %v275_v47 = vpop.permute.xlu0 %274 }
  0xe5   :  { %v1055_v56 = vadd.f32 %v167_v51, %v63_v35  ;;  %v762_v57 = vpop.f32.mrb[6].mxu0 }
  0xe6   :  { %v218_v58 = vadd.f32 %v217_v54, %v216_v50  ;;  %v189_v60 = vadd.f32 %v188_v55, %v187_v49  ;;  %v170_v61 = vpop.f32.mrb[7].mxu0  ;;  %v1066_v4 = vadd.f32 %v762_v57, %v78_v27  ;;  %v212_v8 = vmul.f32 %v1057_v59, %v1057_v59  ;;  %v271_v27 = vpop.permute.xlu1 %270 }
  0xe7   :  { %v190_v63 = vsel %vm182_vm3, %v1055_v56, 0.0  ;;  %v210_v0 = vmul.f32 %v1055_v56, %v1055_v56  ;;  %v1064_v1 = vadd.f32 %v170_v61, %v68_v25  ;;  %v194_v14 = vsel %vm182_vm3, %v1057_v59, 0.0 }
  0xe8   :  { %v191_v2 = vadd.f32 %v190_v63, %v189_v60  ;;  %v220_v3 = vadd.f32 %v219_v62, %v218_v58  ;;  %v213_v13 = vmul.f32 %v1066_v4, %v1066_v4  ;;  %v196_v18 = vsel %vm182_vm3, %v1066_v4, 0.0  ;;  %v303_v62 = vpop.permute.xlu0 %302 }
  0xe9   :  { %v221_v5 = vsel %vm182_vm3, %v210_v0, 0.0  ;;  %v192_v7 = vsel %vm182_vm3, %v1064_v1, 0.0  ;;  %v211_v11 = vmul.f32 %v1064_v1, %v1064_v1  ;;  %v225_v22 = vsel %vm182_vm3, %v212_v8, 0.0 }
  0xea   :  { %v222_v9 = vadd.f32 %v221_v5, %v220_v3  ;;  %v193_v10 = vadd.f32 %v192_v7, %v191_v2  ;;  %v227_v25 = vsel %vm182_vm3, %v213_v13, 0.0  ;;  %v311_v36 = vpop.permute.xlu1 %310 }
  0xeb   :  { %v223_v17 = vsel %vm182_vm3, %v211_v11, 0.0 }
  0xec   :  { %v195_v16 = vadd.f32 %v194_v14, %v193_v10  ;;  %v224_v19 = vadd.f32 %v223_v17, %v222_v9  ;;  %v307_v0 = vpop.permute.xlu0 %306 }
  0xee   :  { %v197_v23 = vadd.f32 %v196_v18, %v195_v16  ;;  %v226_v24 = vadd.f32 %v225_v22, %v224_v19  ;;  %v279_v46 = vpop.permute.xlu1 %278 }
  0xf0   :  { %v198_v26 = vrot.slane %v197_v23, 4  ;;  %v228_v28 = vadd.f32 %v227_v25, %v226_v24  ;;  %v319_v2 = vpop.permute.xlu0 %318 }
  0xf2   :  { %v199_v29 = vadd.f32 %v198_v26, %v197_v23  ;;  %v229_v20 = vrot.slane %v228_v28, 4  ;;  %v315_v61 = vpop.permute.xlu1 %314 }
  0xf4   :  { %v200_v32 = vrot.slane %v199_v29, 2  ;;  %v230_v33 = vadd.f32 %v229_v20, %v228_v28  ;;  %v323_v16 = vpop.permute.xlu0 %322 }
  0xf6   :  { %v201_v35 = vadd.f32 %v200_v32, %v199_v29  ;;  %v231_v40 = vrot.slane %v230_v33, 2 }
  0xf8   :  { %v202_v41 = vrot.slane %v201_v35, 1  ;;  %v232_v42 = vadd.f32 %v231_v40, %v230_v33 }
  0xfa   :  { %v203_v43 = vadd.f32 %v202_v41, %v201_v35  ;;  %v233_v44 = vrot.slane %v232_v42, 1 }
  0xfc   :  { %v205_v45 = vmul.f32 0.015625, %v203_v43  ;;  %v234_v48 = vadd.f32 %v233_v44, %v232_v42 }
  0xfe   :  { %v236_v49 = vmul.f32 %v205_v45, %v205_v45  ;;  %v242_v21 = vsub.f32 %v1031_v38, %v205_v45  ;;  %v243_v15 = vsub.f32 %v1019_v30, %v205_v45  ;;  %v244_v50 = vsub.f32 %v1029_v37, %v205_v45  ;;  %v283_v30 = vpop.permute.xlu1 %282 }
  0xff   :  { %v235_v51 = vmul.f32 0.015625, %v234_v48  ;;  %v241_v53 = vsub.f32 %v1021_v31, %v205_v45  ;;  %v246_v54 = vsub.f32 %v1064_v1, %v205_v45  ;;  %v245_v55 = vsub.f32 %v1055_v56, %v205_v45 }
 0x100   :  { %v247_v57 = vsub.f32 %v1057_v59, %v205_v45  ;;  %v248_v58 = vsub.f32 %v1066_v4, %v205_v45  ;;  %v835_v45 = vld [vmem:[%s1211_s2 + $0x10] sm:$0xff]   ;;  %v875_v48 = vmov 6  }
 0x101   :  { %v237_v60 = vsub.f32 %v235_v51, %v236_v49  ;;  %827 = vset.pattern.permute.xlu1 %v875_v48  ;;  %828 = vset.pattern.permute.xlu0 %v875_v48 }
 0x102   :  { %v287_v37 = vpop.permute.xlu1 %286  ;;  %654 = vperm.xlu1 %827, %v923_v6  }
 0x103   :  { %v238_v63 = vmax.f32 %v237_v60, 0.0 }
 0x105   :  { %v239_v38 = vadd.f32 1e-05, %v238_v63 }
 0x106   :  { %v327_v13 = vpop.permute.xlu1 %326 }
 0x107   :  { %837 = vrsqrt.f32 %v239_v38 }
 0x10a   :  { %v363_v49 = vpop.permute.xlu1 %362 }
 0x111   :  { %v838_v3 = vpop.eup %837 }
 0x112   :  { %v250_v31 = vmul.f32 %v838_v3, %v242_v21  ;;  %v251_v5 = vmul.f32 %v838_v3, %v243_v15  ;;  %v252_v1 = vmul.f32 %v838_v3, %v244_v50  ;;  %v249_v7 = vmul.f32 %v838_v3, %v241_v53  ;;  %v367_v21 = vpop.permute.xlu1 %366  ;;  %v359_v50 = vpop.permute.xlu0 %358 }
 0x113   :  { %v254_v56 = vmul.f32 %v838_v3, %v246_v54  ;;  %v253_v8 = vmul.f32 %v838_v3, %v245_v55  ;;  %v255_v59 = vmul.f32 %v838_v3, %v247_v57  ;;  %v256_v9 = vmul.f32 %v838_v3, %v248_v58 }
 0x114   :  { %v290_v4 = vmul.f32 %v1024_v34, %v250_v31  ;;  %v291_v10 = vmul.f32 %v1076_v12, %v251_v5  ;;  %v292_v11 = vmul.f32 %v271_v27, %v252_v1  ;;  %v289_v14 = vmul.f32 %v259_v39, %v249_v7 }
 0x115   :  { %v294_v17 = vmul.f32 %v279_v46, %v254_v56  ;;  %v293_v18 = vmul.f32 %v275_v47, %v253_v8  ;;  %v295_v19 = vmul.f32 %v283_v30, %v255_v59  ;;  %v296_v22 = vmul.f32 %v287_v37, %v256_v9  ;;  %v836_v46 = vld [vmem:[%s1211_s2 + $0x18] sm:$0xff]  }
 0x116   :  { %v332_v23 = vadd.f32 %v311_v36, %v292_v11  ;;  %v329_v24 = vadd.f32 %v1049_v52, %v289_v14  ;;  %v330_v25 = vadd.f32 %v303_v62, %v290_v4  ;;  %v331_v26 = vadd.f32 %v307_v0, %v291_v10  ;;  %v834_v52 = vld [vmem:[%s1211_s2 + $0x8] sm:$0xff]   ;;  %v375_v15 = vpop.permute.xlu1 %374  ;;  %v371_v53 = vpop.permute.xlu0 %370 }
 0x117   :  { %v333_v28 = vadd.f32 %v315_v61, %v293_v18  ;;  %v334_v29 = vadd.f32 %v319_v2, %v294_v17  ;;  %v336_v20 = vadd.f32 %v327_v13, %v296_v22  ;;  %v335_v32 = vadd.f32 %v323_v16, %v295_v19 }
 0x118   :  { %v340_v34 = vmax.f32 %v332_v23, 0.0  ;;  %v337_v33 = vmax.f32 %v329_v24, 0.0  ;;  %v338_v12 = vmax.f32 %v330_v25, 0.0  ;;  %v339_v27 = vmax.f32 %v331_v26, 0.0 }
 0x119   :  { %v341_v35 = vmax.f32 %v333_v28, 0.0  ;;  %v342_v39 = vmax.f32 %v334_v29, 0.0  ;;  %v344_v40 = vmax.f32 %v336_v20, 0.0  ;;  %v343_v41 = vmax.f32 %v335_v32, 0.0 }
 0x11a   :  { %v354_v42 = vpack.c.bf16 %v340_v34, %v339_v27  ;;  %v353_v43 = vpack.c.bf16 %v338_v12, %v337_v33  ;;  %v873_v47 = vmov 0.0   ;;  %v383_v51 = vpop.permute.xlu1 %382  ;;  %v379_v30 = vpop.permute.xlu0 %378 }
 0x11b   :  { %v355_v44 = vpack.c.bf16 %v342_v39, %v341_v35  ;;  %v356_v36 = vpack.c.bf16 %v344_v40, %v343_v41  ;;  %779 = vmatprep.subr.bf16.mxu0 %v873_v47  ;;  %787 = vmatprep.mubr.msk.bf16.mxu0 %vm874_vm4, %v873_v47 }
 0x11c   :  { %763 = vmatprep.subr.bf16.mxu1 %v353_v43 }
 0x11d   :  { %764 = vmatpush3.bf16.msra.mxu1 %v353_v43 }
 0x11e   :  { %765 = vmatprep.subr.bf16.mxu1 %v354_v42  ;;  %v1121_v62 = vpop.permute.xlu1 %561  ;;  %v387_v24 = vpop.permute.xlu0 %386 }
 0x121   :  { %766 = vmatpush3.bf16.msra.mxu1 %v354_v42 }
 0x122   :  { %767 = vmatprep.subr.bf16.mxu1 %v355_v44  ;;  %v1143_v10 = vpop.permute.xlu1 %601 }
 0x125   :  { %768 = vmatpush3.bf16.msra.mxu1 %v355_v44 }
 0x126   :  { %769 = vmatprep.subr.bf16.mxu1 %v356_v36  ;;  %v1168_v40 = vpop.permute.xlu1 %605 }
 0x129   :  { %770 = vmatpush3.bf16.msra.mxu1 %v356_v36 }
 0x12c   :  { %772 = vmatmul.mubr.msk.bf16.vlgmr.msra.gmra.mrb[0].mxu1 %vm409_vm2, %v834_v52 }
 0x12d   :  { %775 = vmatprep.mubr.msk.bf16.mxu1 %vm409_vm2, %v835_v45 }
 0x134   :  { %776 = vmatmul.mubr.msk.bf16.gmra.mrb[4].mxu1 %vm409_vm2, %v836_v46 }
 0x1ff   :  { %v773_v54 = vpop.f32.mrb[0].mxu1 }
 0x200   :  { %v456_v55 = vpop.f32.mrb[1].mxu1  ;;  %v1117_v57 = vadd.f32 %v773_v54, %v367_v21 }
 0x201   :  { %v1119_v58 = vadd.f32 %v456_v55, %v359_v50  ;;  %v774_v60 = vpop.f32.mrb[2].mxu1 }
 0x202   :  { %v459_v61 = vpop.f32.mrb[3].mxu1  ;;  %v1125_v6 = vadd.f32 %v774_v60, %v371_v53  ;;  %v511_v0 = vmul.f32 %v1117_v57, %v1117_v57  ;;  %v490_v5 = vsel %vm182_vm3, %v1117_v57, 0.0 }
 0x203   :  { %v509_v63 = vmul.f32 %v1119_v58, %v1119_v58  ;;  %v1127_v38 = vadd.f32 %v459_v61, %v363_v49  ;;  %v487_v37 = vsel %vm182_vm3, %v1119_v58, 0.0  ;;  %v610_v61 = vpop.permute.xlu0 %609 }
 0x204   :  { %v512_v7 = vmul.f32 %v1125_v6, %v1125_v6  ;;  %v520_v11 = vsel %vm182_vm3, %v511_v0, 0.0  ;;  %v492_v14 = vsel %vm182_vm3, %v1125_v6, 0.0 }
 0x205   :  { %v488_v2 = vsel %vm182_vm3, %v1127_v38, 0.0  ;;  %v510_v3 = vmul.f32 %v1127_v38, %v1127_v38  ;;  %v517_v1 = vsel %vm182_vm3, %v509_v63, 0.0 }
 0x206   :  { %v489_v31 = vadd.f32 %v488_v2, %v487_v37  ;;  %v522_v23 = vsel %vm182_vm3, %v512_v7, 0.0 }
 0x207   :  { %v518_v56 = vsel %vm182_vm3, %v510_v3, 0.0  ;;  %v777_v8 = vpop.f32.mrb[4].mxu1 }
 0x208   :  { %v491_v59 = vadd.f32 %v490_v5, %v489_v31  ;;  %v519_v9 = vadd.f32 %v518_v56, %v517_v1  ;;  %v472_v4 = vpop.f32.mrb[5].mxu1  ;;  %v1150_v18 = vadd.f32 %v777_v8, %v383_v51  ;;  %v566_v5 = vpop.permute.xlu0 %565 }
 0x209   :  { %v1148_v13 = vadd.f32 %v472_v4, %v375_v15  ;;  %v778_v16 = vpop.f32.mrb[6].mxu1  ;;  %v574_v15 = vpop.permute.xlu1 %573 }
 0x20a   :  { %v521_v17 = vadd.f32 %v520_v11, %v519_v9  ;;  %v493_v19 = vadd.f32 %v492_v14, %v491_v59  ;;  %v475_v22 = vpop.f32.mrb[7].mxu1  ;;  %v1159_v32 = vadd.f32 %v778_v16, %v387_v24  ;;  %v515_v12 = vmul.f32 %v1150_v18, %v1150_v18 }
 0x20b   :  { %v494_v25 = vsel %vm182_vm3, %v1148_v13, 0.0  ;;  %v513_v26 = vmul.f32 %v1148_v13, %v1148_v13  ;;  %v1157_v28 = vadd.f32 %v475_v22, %v379_v30  ;;  %v498_v41 = vsel %vm182_vm3, %v1150_v18, 0.0 }
 0x20c   :  { %v495_v29 = vadd.f32 %v494_v25, %v493_v19  ;;  %v523_v20 = vadd.f32 %v522_v23, %v521_v17  ;;  %v516_v42 = vmul.f32 %v1159_v32, %v1159_v32  ;;  %v500_v36 = vsel %vm182_vm3, %v1159_v32, 0.0  ;;  %v570_v23 = vpop.permute.xlu0 %569 }
 0x20d   :  { %v524_v34 = vsel %vm182_vm3, %v513_v26, 0.0  ;;  %v496_v33 = vsel %vm182_vm3, %v1157_v28, 0.0  ;;  %v514_v39 = vmul.f32 %v1157_v28, %v1157_v28  ;;  %v528_v45 = vsel %vm182_vm3, %v515_v12, 0.0  ;;  %v614_v63 = vpop.permute.xlu1 %613 }
 0x20e   :  { %v525_v27 = vadd.f32 %v524_v34, %v523_v20  ;;  %v497_v35 = vadd.f32 %v496_v33, %v495_v29  ;;  %v530_v49 = vsel %vm182_vm3, %v516_v42, 0.0 }
 0x20f   :  { %v526_v44 = vsel %vm182_vm3, %v514_v39, 0.0 }
 0x210   :  { %v499_v43 = vadd.f32 %v498_v41, %v497_v35  ;;  %v527_v52 = vadd.f32 %v526_v44, %v525_v27 }
 0x211   :  { %v578_v1 = vpop.permute.xlu1 %577 }
 0x212   :  { %v501_v46 = vadd.f32 %v500_v36, %v499_v43  ;;  %v529_v48 = vadd.f32 %v528_v45, %v527_v52 }
 0x214   :  { %v502_v21 = vrot.slane %v501_v46, 4  ;;  %v531_v50 = vadd.f32 %v530_v49, %v529_v48 }
 0x215   :  { %v618_v24 = vpop.permute.xlu1 %617 }
 0x216   :  { %v503_v51 = vadd.f32 %v502_v21, %v501_v46  ;;  %v532_v53 = vrot.slane %v531_v50, 4 }
 0x218   :  { %v504_v54 = vrot.slane %v503_v51, 2  ;;  %v533_v55 = vadd.f32 %v532_v53, %v531_v50 }
 0x219   :  { %v622_v26 = vpop.permute.xlu1 %621 }
 0x21a   :  { %v505_v60 = vadd.f32 %v504_v54, %v503_v51  ;;  %v534_v30 = vrot.slane %v533_v55, 2 }
 0x21c   :  { %v506_v0 = vrot.slane %v505_v60, 1  ;;  %v535_v37 = vadd.f32 %v534_v30, %v533_v55 }
 0x21d   :  { %v590_v29 = vpop.permute.xlu1 %589 }
 0x21e   :  { %v507_v2 = vadd.f32 %v506_v0, %v505_v60  ;;  %v536_v3 = vrot.slane %v535_v37, 1 }
 0x220   :  { %v508_v31 = vmul.f32 0.015625, %v507_v2  ;;  %v537_v7 = vadd.f32 %v536_v3, %v535_v37 }
 0x221   :  { %v630_v42 = vpop.permute.xlu1 %629 }
 0x222   :  { %v539_v56 = vmul.f32 %v508_v31, %v508_v31  ;;  %v544_v8 = vsub.f32 %v1119_v58, %v508_v31  ;;  %v547_v59 = vsub.f32 %v1125_v6, %v508_v31  ;;  %v545_v9 = vsub.f32 %v1127_v38, %v508_v31  ;;  %v582_v6 = vpop.permute.xlu0 %581 }
 0x223   :  { %v538_v4 = vmul.f32 0.015625, %v537_v7  ;;  %v548_v11 = vsub.f32 %v1148_v13, %v508_v31  ;;  %v546_v14 = vsub.f32 %v1117_v57, %v508_v31  ;;  %v549_v16 = vsub.f32 %v1157_v28, %v508_v31 }
 0x224   :  { %v550_v17 = vsub.f32 %v1150_v18, %v508_v31  ;;  %v551_v19 = vsub.f32 %v1159_v32, %v508_v31 }
 0x225   :  { %v540_v22 = vsub.f32 %v538_v4, %v539_v56 }
 0x226   :  { %v586_v38 = vpop.permute.xlu0 %585 }
 0x227   :  { %v541_v25 = vmax.f32 %v540_v22, 0.0 }
 0x229   :  { %v542_v58 = vadd.f32 1e-05, %v541_v25 }
 0x22a   :  { %v626_v43 = vpop.permute.xlu0 %625 }
 0x22b   :  { %839 = vrsqrt.f32 %v542_v58 }
 0x235   :  { %v840_v20 = vpop.eup %839 }
 0x236   :  { %v552_v13 = vmul.f32 %v840_v20, %v544_v8  ;;  %v555_v34 = vmul.f32 %v840_v20, %v547_v59  ;;  %v553_v57 = vmul.f32 %v840_v20, %v545_v9  ;;  %v556_v33 = vmul.f32 %v840_v20, %v548_v11 }
 0x237   :  { %v554_v28 = vmul.f32 %v840_v20, %v546_v14  ;;  %v557_v12 = vmul.f32 %v840_v20, %v549_v16  ;;  %v558_v18 = vmul.f32 %v840_v20, %v550_v17  ;;  %v559_v27 = vmul.f32 %v840_v20, %v551_v19 }
 0x238   :  { %v592_v32 = vmul.f32 %v1121_v62, %v552_v13  ;;  %v595_v35 = vmul.f32 %v574_v15, %v555_v34  ;;  %v593_v39 = vmul.f32 %v566_v5, %v553_v57  ;;  %v596_v41 = vmul.f32 %v578_v1, %v556_v33 }
 0x239   :  { %v594_v44 = vmul.f32 %v570_v23, %v554_v28  ;;  %v597_v36 = vmul.f32 %v582_v6, %v557_v12  ;;  %v598_v52 = vmul.f32 %v586_v38, %v558_v18  ;;  %v599_v45 = vmul.f32 %v590_v29, %v559_v27 }
 0x23a   :  { %v632_v46 = vadd.f32 %v1143_v10, %v592_v32  ;;  %v635_v48 = vadd.f32 %v614_v63, %v595_v35  ;;  %v633_v49 = vadd.f32 %v1168_v40, %v593_v39  ;;  %v636_v21 = vadd.f32 %v618_v24, %v596_v41  ;;  %v648_v40 = vld [vmem:[%s1212_s3] sm:$0x1] }
 0x23b   :  { %v634_v50 = vadd.f32 %v610_v61, %v594_v44  ;;  %v637_v51 = vadd.f32 %v622_v26, %v597_v36  ;;  %v639_v53 = vadd.f32 %v630_v42, %v599_v45  ;;  %v638_v54 = vadd.f32 %v626_v43, %v598_v52  ;;  %v655_v61 = vpop.permute.xlu1 %654 }
 0x23c   :  { %v640_v62 = vmax.f32 %v632_v46, 0.0  ;;  %v643_v15 = vmax.f32 %v635_v48, 0.0  ;;  %v641_v55 = vmax.f32 %v633_v49, 0.0  ;;  %v644_v60 = vmax.f32 %v636_v21, 0.0 }
 0x23d   :  { %v642_v30 = vmax.f32 %v634_v50, 0.0  ;;  %v645_v0 = vmax.f32 %v637_v51, 0.0  ;;  %v647_v37 = vmax.f32 %v639_v53, 0.0  ;;  %v646_v2 = vmax.f32 %v638_v54, 0.0 }
 0x23e   :  { %v649_v3 = vpack.c.bf16 %v641_v55, %v640_v62 }
 0x23f   :  { %v650_v31 = vpack.c.bf16 %v643_v15, %v642_v30  ;;  %v651_v5 = vpack.c.bf16 %v645_v0, %v644_v60  ;;  %v652_v10 = vpack.c.bf16 %v647_v37, %v646_v2 }
 0x240   :  { %780 = vmatpush3.bf16.msra.mxu0 %v649_v3 }
 0x241   :  { %781 = vmatprep.subr.bf16.mxu0 %v873_v47 }
 0x244   :  { %782 = vmatpush3.bf16.msra.mxu0 %v650_v31 }
 0x245   :  { %783 = vmatprep.subr.bf16.mxu0 %v873_v47 }
 0x248   :  { %784 = vmatpush3.bf16.msra.mxu0 %v651_v5 }
 0x249   :  { %785 = vmatprep.subr.bf16.mxu0 %v873_v47 }
 0x24c   :  { %786 = vmatpush3.bf16.msra.mxu0 %v652_v10 }
 0x24f   :  { %788 = vmatmul.mubr.msk.bf16.vlgmr.msra.gmra.mrb[8].mxu0 %vm409_vm2, %v648_v40 }
 0x322   :  { %v694_v63 = vpop.f32.mrb[8].mxu0 }
 0x323   :  { %v695_v1 = vadd.f32 %v694_v63, %v655_v61  ;;  %v789_v7 = vpop.f32.mrb[9].mxu0 }
 0x324   :  { %v697_v56 = vpop.f32.mrb[10].mxu0 }
 0x325   :  { %841 = vtanh.f32 %v695_v1  ;;  %v790_v8 = vpop.f32.mrb[11].mxu0 }
 0x32f   :  { %v842_v59 = vpop.eup %841 }
 0x330   :  { %v701_v9 = vmul.f32 0.1, %v842_v59 }
 0x332   :  { %703 = vst.msk [vmem:[#allocation2] sm:$0x3] %vm702_vm5, %v701_v9 }
 0x333   :  { %854 = shalt.err (!%p851_p4)
}
 0x334   :  { %s855_s28 = scalar_lea.hbm %s1214_s5, 32 }
 0x335   :  { %p856_p5 = scmp.ne.s32.totalorder %s1214_s5, %s855_s28  ;;  %p859_p6 = scmp.lt.u32.totalorder %s855_s28, %s1214_s5 }
 0x337   :  { %p861_p7 = pnand %p859_p6, %p856_p5 }
 0x339   :  { %864 = shalt.err (!%p861_p7)
}
 0x33a   :  { %713 = dma.vmem_to_hbm [thread:$0]  %s711_s0, 32, %s1214_s5, [#allocation3]  }
 0x33b   :  { %865 = dma.done.wait [#allocation3], 32  }
 0x33c   :  { %866 = vsyncadd [#allocation3], 4294967264 }
 0x33d   :  { %717 = vsyncpa [#allocation3], 1 }

</bundles_post_ra>
